<compile_context>
chip_gen: v7x
topology: tpu7x:2x2x1
jax: 0.10.0
libtpu: 0.0.40
codegen_flags: <defaults>
</compile_context>

<pallas_src>
import functools

import jax
import jax.numpy as jnp
from jax.experimental import pallas as pl
from jax.experimental.pallas import tpu as pltpu


def _round_up(x, m):
    return -(-x // m) * m


# ----------------------------------------------------------------------------
# Pallas kernel: one GRU layer, BOTH directions, time-blocked sequential grid.
# grid = (dirs, n_blocks); direction axis is "parallel", time axis "arbitrary".
# ----------------------------------------------------------------------------
def _gru_kernel(gi_ref, whh_ref, bhn_ref, hids_ref, h_ref, *,
                t_blk, seq_len, n_blocks):
    """One grid step = t_blk timesteps of the GRU recurrence for one direction.

    gi_ref  : (t_blk, Bp, 3*Hp) bf16  precomputed x-projection (+folded biases)
    whh_ref : (Hp, 3*Hp)        bf16  fused, lane-padded recurrent weight
    bhn_ref : (1, Hp)           f32   b_hh of the n gate
    hids_ref: (t_blk, Bp, Hp)   bf16  per-step hidden states for this block
    h_ref   : (Bp, Hp)          f32   VMEM hidden state carried across blocks
    """
    d = pl.program_id(0)    # direction: 0 = forward, 1 = backward
    tb = pl.program_id(1)   # time-block index within this direction's sweep

    @pl.when(tb == 0)
    def _():
        h_ref[...] = jnp.zeros_like(h_ref)

    # Loop-invariant loads (hoisted out of the serial loop).
    whh = whh_ref[...]                      # (Hp, 3Hp) bf16, stays resident
    bhn = bhn_ref[...]                      # (1, Hp) f32, sublane-broadcasts
    hp = whh.shape[0]

    need_mask = (n_blocks * t_blk != seq_len)
    # Original-time block index (the BlockSpec index map uses the same formula;
    # recomputed here only for tail masking of the padded sequence).
    b_eff = tb + d * (n_blocks - 1 - 2 * tb)

    def step(i, h):
        # Backward direction (d == 1) iterates the block in reverse so hids
        # land directly in original time order (no HBM reversal).
        idx = i + d * (t_blk - 1 - 2 * i)

        gi = gi_ref[idx].astype(jnp.float32)            # one (Bp, 3Hp) load
        # Single fused recurrent matmul (bf16 inputs, f32 accumulation).
        gh = jnp.dot(h.astype(jnp.bfloat16), whh,
                     preferred_element_type=jnp.float32)  # (Bp, 3Hp)

        # PyTorch GRU: r = s(gi_r+gh_r), z = s(gi_z+gh_z),
        #              n = tanh(gi_n + r*(gh_n + b_hn)), h' = (1-z)*n + z*h
        # (b_ih for all gates and b_hh for r/z are folded into gi.)
        r = jax.nn.sigmoid(gi[:, :hp] + gh[:, :hp])
        z = jax.nn.sigmoid(gi[:, hp:2 * hp] + gh[:, hp:2 * hp])
        n = jnp.tanh(gi[:, 2 * hp:] + r * (gh[:, 2 * hp:] + bhn))
        h_new = (1.0 - z) * n + z * h

        if need_mask:  # only traced when S was padded to a multiple of t_blk
            orig_t = b_eff * t_blk + idx
            h_new = jnp.where(orig_t < seq_len, h_new, h)

        hids_ref[idx] = h_new.astype(hids_ref.dtype)
        return h_new

    h_ref[...] = jax.lax.fori_loop(0, t_blk, step, h_ref[...],
                                   unroll=min(t_blk, 8))


# ----------------------------------------------------------------------------
# One GRU layer (all directions) via a single pallas_call.
# ----------------------------------------------------------------------------
def gru_layer(x_tm, layer_ws, *, hidden, t_blk):
    """x_tm: (S, Bp, E) f32 time-major input (batch already padded to Bp).
    layer_ws: list (len = dirs) of dicts with w_ih (3H,E), w_hh (3H,H),
    b_ih (3H,), b_hh (3H,).  Returns (S, Bp, dirs*hidden) f32, original time
    order for both directions.
    """
    dirs = len(layer_ws)
    S, Bp, E = x_tm.shape
    H = hidden
    Hp = _round_up(H, 128)
    nb = pl.cdiv(S, t_blk)
    s_pad = nb * t_blk

    gi_list, whh_list, bhn_list = [], [], []
    for d in range(dirs):
        w = layer_ws[d]
        w_ih, w_hh, b_ih, b_hh = w["w_ih"], w["w_hh"], w["b_ih"], w["b_hh"]

        # Lane-padded, gate-aligned input weight / folded bias so gi comes out
        # of one big XLA matmul already in (S, B, 3*Hp) kernel layout.
        w_ih_p = jnp.zeros((3 * Hp, E), jnp.float32)
        b_p = jnp.zeros((3 * Hp,), jnp.float32)
        for g in range(3):
            w_ih_p = w_ih_p.at[g * Hp:g * Hp + H].set(w_ih[g * H:(g + 1) * H])
            bg = b_ih[g * H:(g + 1) * H]
            if g < 2:  # fold b_hh for the r and z gates
                bg = bg + b_hh[g * H:(g + 1) * H]
            b_p = b_p.at[g * Hp:g * Hp + H].set(bg)
        gi = jnp.einsum("sbe,ge->sbg", x_tm.astype(jnp.float32), w_ih_p) + b_p
        if s_pad != S:
            gi = jnp.pad(gi, ((0, s_pad - S), (0, 0), (0, 0)))
        gi_list.append(gi.astype(jnp.bfloat16))          # (S_pad, Bp, 3Hp)

        # Fused, lane-padded recurrent weight: gh = h @ whh, gates at
        # lane offsets 0 / Hp / 2Hp (tile-aligned slices in the kernel).
        whh = jnp.zeros((Hp, 3 * Hp), jnp.float32)
        for g in range(3):
            whh = whh.at[:H, g * Hp:g * Hp + H].set(
                jnp.transpose(w_hh[g * H:(g + 1) * H, :]))
        whh_list.append(whh.astype(jnp.bfloat16))

        bhn = jnp.zeros((1, Hp), jnp.float32).at[0, :H].set(b_hh[2 * H:3 * H])
        bhn_list.append(bhn)

    gi_all = jnp.stack(gi_list, axis=0)      # (dirs, S_pad, Bp, 3Hp) bf16
    whh_all = jnp.stack(whh_list, axis=0)    # (dirs, Hp, 3Hp)        bf16
    bhn_all = jnp.stack(bhn_list, axis=0)    # (dirs, 1, Hp)          f32

    kernel = functools.partial(_gru_kernel, t_blk=t_blk, seq_len=S,
                               n_blocks=nb)

    # Forward (d=0): time blocks 0..nb-1; backward (d=1): nb-1..0.
    def dir_time_map(d, tb):
        return (d, tb + d * (nb - 1 - 2 * tb), 0, 0)

    grid_spec = pltpu.PrefetchScalarGridSpec(
        num_scalar_prefetch=0,
        grid=(dirs, nb),
        in_specs=[
            pl.BlockSpec((None, t_blk, Bp, 3 * Hp), dir_time_map),
            pl.BlockSpec((None, Hp, 3 * Hp), lambda d, tb: (d, 0, 0)),
            pl.BlockSpec((None, 1, Hp), lambda d, tb: (d, 0, 0)),
        ],
        out_specs=pl.BlockSpec((None, t_blk, Bp, Hp), dir_time_map),
        scratch_shapes=[pltpu.VMEM((Bp, Hp), jnp.float32)],
    )

    hids = pl.pallas_call(
        kernel,
        out_shape=jax.ShapeDtypeStruct((dirs, s_pad, Bp, Hp), jnp.bfloat16),
        grid_spec=grid_spec,
        compiler_params=pltpu.CompilerParams(
            # direction axis is truly parallel (2 TensorCores on v7x);
            # the time axis is a real sequential recurrence.
            dimension_semantics=("parallel", "arbitrary"),
            vmem_limit_bytes=48 * 1024 * 1024,
        ),
    )(gi_all, whh_all, bhn_all)

    # Strip time/lane padding, back to f32 for the next layer / outputs.
    outs = [hids[d, :S, :, :H].astype(jnp.float32) for d in range(dirs)]
    return jnp.concatenate(outs, axis=-1)                # (S, Bp, dirs*H)


def _pick_t_blk(S, Bp, Hp):
    """Size the time block against a conservative cross-generation VMEM budget
    (double-buffered bf16 gi + hids streams; fits v7x's 64 MiB comfortably)."""
    budget = 16 * 1024 * 1024
    per_step = 2 * (Bp * 3 * Hp * 2 + Bp * Hp * 2)  # 2 buffers, bf16
    t = max(1, budget // per_step)
    return int(min(t, 512, S))


# ----------------------------------------------------------------------------
# Encoder forward (glue in plain JAX, recurrence in the Pallas kernel above).
# ----------------------------------------------------------------------------
def encoder_forward(params, token_ids, n_layers, bidirectional, t_blk=None,
                    noise=False, noise_radius=0.2, noise_key=None):
    dirs = 2 if bidirectional else 1
    B, S = token_ids.shape
    H = params["rnn"][0][0]["w_hh"].shape[1]

    # Embedding lookup (gather) stays in plain JAX.
    emb = jnp.take(params["embedding"], token_ids, axis=0)        # (B, S, E)
    # F.dropout with training=False is the identity (eval mode).
    # TODO(synk): training-mode dropout mask not implemented (module runs eval).
    x = jnp.transpose(emb, (1, 0, 2)).astype(jnp.float32)         # (S, B, E)

    # Pad batch to >=8 sublanes so every in-kernel load/store is dense.
    Bp = max(8, _round_up(B, 8))
    if Bp != B:
        x = jnp.pad(x, ((0, 0), (0, Bp - B), (0, 0)))

    Hp = _round_up(H, 128)
    if t_blk is None:
        t_blk = _pick_t_blk(S, Bp, Hp)
    t_blk = min(t_blk, S)

    layer_input = x
    for layer in range(n_layers):
        layer_input = gru_layer(layer_input, params["rnn"][layer],
                                hidden=H, t_blk=t_blk)    # (S, Bp, dirs*H)

    hids = jnp.transpose(layer_input[:, :B], (1, 0, 2))   # (B, S, dirs*H)
    # enc == h_n[-1].transpose(1,0).reshape(B, dirs*H):
    #   forward final hidden  = hids[:, S-1, :H]
    #   backward final hidden = hids[:, 0,  H:]   (already time-aligned)
    if bidirectional:
        enc = jnp.concatenate([hids[:, -1, :H], hids[:, 0, H:]], axis=-1)
    else:
        enc = hids[:, -1, :]

    if noise and noise_radius > 0:
        enc = enc + noise_radius * jax.random.normal(noise_key, enc.shape,
                                                     enc.dtype)
    return enc, hids


# ----------------------------------------------------------------------------
# Pure-JAX reference (lax.scan GRU, f32) for correctness checking.
# ----------------------------------------------------------------------------
def _gru_layer_ref(x_tm, w_ih, w_hh, b_ih, b_hh, reverse):
    S, B, _ = x_tm.shape
    H = w_hh.shape[1]
    xs = x_tm[::-1] if reverse else x_tm

    def cell(h, xt):
        gi = xt @ w_ih.T + b_ih
        gh = h @ w_hh.T + b_hh
        r = jax.nn.sigmoid(gi[:, :H] + gh[:, :H])
        z = jax.nn.sigmoid(gi[:, H:2 * H] + gh[:, H:2 * H])
        n = jnp.tanh(gi[:, 2 * H:] + r * gh[:, 2 * H:])
        h_new = (1.0 - z) * n + z * h
        return h_new, h_new

    _, ys = jax.lax.scan(cell, jnp.zeros((B, H), jnp.float32), xs)
    return ys[::-1] if reverse else ys


def encoder_ref(params, token_ids, n_layers, bidirectional):
    dirs = 2 if bidirectional else 1
    H = params["rnn"][0][0]["w_hh"].shape[1]
    emb = jnp.take(params["embedding"], token_ids, axis=0)
    layer_input = jnp.transpose(emb, (1, 0, 2)).astype(jnp.float32)
    for layer in range(n_layers):
        outs = []
        for d in range(dirs):
            w = params["rnn"][layer][d]
            outs.append(_gru_layer_ref(layer_input, w["w_ih"], w["w_hh"],
                                       w["b_ih"], w["b_hh"], reverse=(d == 1)))
        layer_input = jnp.concatenate(outs, axis=-1)
    hids = jnp.transpose(layer_input, (1, 0, 2))
    if bidirectional:
        enc = jnp.concatenate([hids[:, -1, :H], hids[:, 0, H:]], axis=-1)
    else:
        enc = hids[:, -1, :]
    return enc, hids


# ----------------------------------------------------------------------------
# Deterministic parameter construction (mirrors nn.GRU parameter shapes).
# ----------------------------------------------------------------------------
def _orthogonal(key, rows, cols):
    a = jax.random.normal(key, (max(rows, cols), min(rows, cols)), jnp.float32)
    q, _ = jnp.linalg.qr(a)
    q = q[:rows, :cols] if rows >= cols else q.T[:rows, :cols]
    return q.astype(jnp.float32)


def make_params(key, vocab, input_size, hidden_size, n_layers, bidirectional):
    dirs = 2 if bidirectional else 1
    keys = jax.random.split(key, 1 + n_layers * dirs * 2)
    params = {"embedding": 0.1 * jax.random.normal(
        keys[0], (vocab, input_size), jnp.float32)}

    rnn = []
    k_idx = 1
    for layer in range(n_layers):
        in_sz = input_size if layer == 0 else dirs * hidden_size
        layer_dirs = []
        for _ in range(dirs):
            # nn.GRU: weight_ih (3H, in), weight_hh (3H, H) -> orthogonal init;
            # biases default uniform, here deterministic small constants.
            w_ih = _orthogonal(keys[k_idx], 3 * hidden_size, in_sz); k_idx += 1
            w_hh = _orthogonal(keys[k_idx], 3 * hidden_size, hidden_size); k_idx += 1
            layer_dirs.append({
                "w_ih": w_ih,                                    # (3H, in)
                "w_hh": w_hh,                                    # (3H, H)
                "b_ih": jnp.full((3 * hidden_size,), 0.01, jnp.float32),
                "b_hh": jnp.full((3 * hidden_size,), -0.01, jnp.float32),
            })
        rnn.append(layer_dirs)
    params["rnn"] = rnn
    return params


if __name__ == "__main__":
    # Small config consistent with the module's constructor.
    VOCAB = 50
    INPUT_SIZE = 32      # embedding dim == GRU input_size
    HIDDEN = 32
    N_LAYERS = 2
    BIDIRECTIONAL = True
    BATCH, SEQ = 2, 8
    T_BLK = 4            # 2 time blocks -> exercises the cross-block h carry

    key = jax.random.PRNGKey(0)
    k_param, k_tok = jax.random.split(key)

    params = make_params(k_param, VOCAB, INPUT_SIZE, HIDDEN, N_LAYERS,
                         BIDIRECTIONAL)
    token_ids = jax.random.randint(k_tok, (BATCH, SEQ), 0, VOCAB,
                                   dtype=jnp.int32)

    fwd = jax.jit(functools.partial(
        encoder_forward, n_layers=N_LAYERS, bidirectional=BIDIRECTIONAL,
        t_blk=T_BLK, noise=False))
    enc, hids = fwd(params, token_ids)
    jax.block_until_ready((enc, hids))

    dirs = 2 if BIDIRECTIONAL else 1
    assert enc.shape == (BATCH, dirs * HIDDEN), enc.shape
    assert hids.shape == (BATCH, SEQ, dirs * HIDDEN), hids.shape
    assert bool(jnp.all(jnp.isfinite(enc))) and bool(jnp.all(jnp.isfinite(hids)))

    # Correctness check against a pure-JAX f32 scan reference.  Tolerance is
    # loosened vs the all-f32 version because gi/hids are stored in bf16 and
    # the recurrent matmul takes bf16 inputs (f32 accumulation / gate math).
    enc_r, hids_r = jax.jit(functools.partial(
        encoder_ref, n_layers=N_LAYERS,
        bidirectional=BIDIRECTIONAL))(params, token_ids)
    jax.block_until_ready((enc_r, hids_r))
    err_enc = float(jnp.max(jnp.abs(enc - enc_r)))
    err_hid = float(jnp.max(jnp.abs(hids - hids_r)))
    assert err_enc < 5e-2 and err_hid < 5e-2, (err_enc, err_hid)

    print("KERNEL_OK")
</pallas_src>

<mosaic_0001>
module attributes {stable_mosaic.version = 11 : i64} {
  func.func @_gru_kernel(%arg0: i32, %arg1: i32, %arg2: memref<1x4x8x384xbf16, #tpu.memory_space<vmem>>, %arg3: memref<1x128x384xbf16, #tpu.memory_space<vmem>>, %arg4: memref<1x1x128xf32, #tpu.memory_space<vmem>>, %arg5: memref<1x4x8x128xbf16, #tpu.memory_space<vmem>>, %arg6: memref<8x128xf32, #tpu.memory_space<vmem>>) attributes {dimension_semantics = [#tpu.dimension_semantics<parallel>, #tpu.dimension_semantics<arbitrary>], iteration_bounds = array<i64: 2, 2>, scalar_prefetch = 0 : i64, scratch_operands = 1 : i64, tpu.core_type = #tpu.core_type<tc>, window_params = [{transform_indices = @transform_0, window_bounds = array<i64: 1, 4, 8, 384>}, {transform_indices = @transform_1, window_bounds = array<i64: 1, 128, 384>}, {transform_indices = @transform_2, window_bounds = array<i64: 1, 1, 128>}, {transform_indices = @transform_3, window_bounds = array<i64: 1, 4, 8, 128>}]} {
    %c0_i32 = arith.constant 0 : i32
    %0 = arith.cmpi eq, %arg1, %c0_i32 : i32
    %1 = arith.extui %0 : i1 to i32
    %c0_i32_0 = arith.constant 0 : i32
    %2 = arith.cmpi ne, %1, %c0_i32_0 : i32
    scf.if %2 {
      %cst_58 = arith.constant 0.000000e+00 : f32
      %181 = vector.broadcast %cst_58 : f32 to vector<8x128xf32>
      %c0_59 = arith.constant 0 : index
      %c0_60 = arith.constant 0 : index
      %182 = vector.load %arg6[%c0_59, %c0_60] : memref<8x128xf32, #tpu.memory_space<vmem>>, vector<8x128xf32>
      tpu.vector_store %arg6[%c0_59, %c0_60], %181 {strides = array<i32>} : memref<8x128xf32, #tpu.memory_space<vmem>>, vector<8x128xf32>,
    } else {
    }
    %c0 = arith.constant 0 : index
    %c0_1 = arith.constant 0 : index
    %c0_2 = arith.constant 0 : index
    %3 = vector.load %arg3[%c0, %c0_1, %c0_2] : memref<1x128x384xbf16, #tpu.memory_space<vmem>>, vector<1x128x384xbf16>
    %4 = vector.shape_cast %3 : vector<1x128x384xbf16> to vector<128x384xbf16>
    %c0_3 = arith.constant 0 : index
    %c0_4 = arith.constant 0 : index
    %c0_5 = arith.constant 0 : index
    %5 = vector.load %arg4[%c0_3, %c0_4, %c0_5] : memref<1x1x128xf32, #tpu.memory_space<vmem>>, vector<1x1x128xf32>
    %6 = vector.shape_cast %5 : vector<1x1x128xf32> to vector<1x128xf32>
    %c0_6 = arith.constant 0 : index
    %c0_7 = arith.constant 0 : index
    %7 = vector.load %arg6[%c0_6, %c0_7] : memref<8x128xf32, #tpu.memory_space<vmem>>, vector<8x128xf32>
    %c0_i32_8 = arith.constant 0 : i32
    %c2_i32 = arith.constant 2 : i32
    %8 = arith.muli %c2_i32, %c0_i32_8 : i32
    %c3_i32 = arith.constant 3 : i32
    %9 = arith.subi %c3_i32, %8 : i32
    %10 = arith.muli %arg0, %9 : i32
    %11 = arith.addi %c0_i32_8, %10 : i32
    %c0_9 = arith.constant 0 : index
    %12 = arith.index_cast %11 : i32 to index
    %c0_10 = arith.constant 0 : index
    %c0_11 = arith.constant 0 : index
    %13 = vector.load %arg2[%c0_9, %12, %c0_10, %c0_11] : memref<1x4x8x384xbf16, #tpu.memory_space<vmem>>, vector<1x1x8x384xbf16>
    %14 = vector.shape_cast %13 : vector<1x1x8x384xbf16> to vector<8x384xbf16>
    %15 = arith.extf %14 : vector<8x384xbf16> to vector<8x384xf32>
    %16 = arith.truncf %7 : vector<8x128xf32> to vector<8x128xbf16>
    %cst = arith.constant dense<0.000000e+00> : vector<8x384xf32>
    %17 = tpu.matmul %16, %4, %cst {dimension_numbers = #tpu.dot_dimension_numbers<[1], [0], [0], [1], [0, 0, 1, 1], [], []>} : vector<8x128xbf16>, vector<128x384xbf16>, vector<8x384xf32> -> vector<8x384xf32>
    %18 = vector.extract_strided_slice %15 {offsets = [0, 0], sizes = [8, 128], strides = [1, 1]} : vector<8x384xf32> to vector<8x128xf32>
    %19 = vector.extract_strided_slice %17 {offsets = [0, 0], sizes = [8, 128], strides = [1, 1]} : vector<8x384xf32> to vector<8x128xf32>
    %20 = arith.addf %18, %19 : vector<8x128xf32>
    %21 = arith.negf %20 : vector<8x128xf32>
    %22 = math.exp %21 : vector<8x128xf32>
    %cst_12 = arith.constant 1.000000e+00 : f32
    %23 = vector.broadcast %cst_12 : f32 to vector<8x128xf32>
    %24 = arith.addf %23, %22 : vector<8x128xf32>
    %25 = arith.divf %23, %24 : vector<8x128xf32>
    %26 = vector.extract_strided_slice %15 {offsets = [0, 128], sizes = [8, 128], strides = [1, 1]} : vector<8x384xf32> to vector<8x128xf32>
    %27 = vector.extract_strided_slice %17 {offsets = [0, 128], sizes = [8, 128], strides = [1, 1]} : vector<8x384xf32> to vector<8x128xf32>
    %28 = arith.addf %26, %27 : vector<8x128xf32>
    %29 = arith.negf %28 : vector<8x128xf32>
    %30 = math.exp %29 : vector<8x128xf32>
    %cst_13 = arith.constant 1.000000e+00 : f32
    %31 = vector.broadcast %cst_13 : f32 to vector<8x128xf32>
    %32 = arith.addf %31, %30 : vector<8x128xf32>
    %33 = arith.divf %31, %32 : vector<8x128xf32>
    %34 = vector.extract_strided_slice %15 {offsets = [0, 256], sizes = [8, 128], strides = [1, 1]} : vector<8x384xf32> to vector<8x128xf32>
    %35 = vector.extract_strided_slice %17 {offsets = [0, 256], sizes = [8, 128], strides = [1, 1]} : vector<8x384xf32> to vector<8x128xf32>
    %36 = vector.broadcast %6 : vector<1x128xf32> to vector<8x128xf32>
    %37 = arith.addf %35, %36 : vector<8x128xf32>
    %38 = arith.mulf %25, %37 : vector<8x128xf32>
    %39 = arith.addf %34, %38 : vector<8x128xf32>
    %40 = math.tanh %39 : vector<8x128xf32>
    %cst_14 = arith.constant 1.000000e+00 : f32
    %41 = vector.broadcast %cst_14 : f32 to vector<8x128xf32>
    %42 = arith.subf %41, %33 : vector<8x128xf32>
    %43 = arith.mulf %42, %40 : vector<8x128xf32>
    %44 = arith.mulf %33, %7 : vector<8x128xf32>
    %45 = arith.addf %43, %44 : vector<8x128xf32>
    %46 = arith.truncf %45 : vector<8x128xf32> to vector<8x128xbf16>
    %c0_15 = arith.constant 0 : index
    %47 = arith.index_cast %11 : i32 to index
    %c0_16 = arith.constant 0 : index
    %c0_17 = arith.constant 0 : index
    %48 = vector.load %arg5[%c0_15, %47, %c0_16, %c0_17] : memref<1x4x8x128xbf16, #tpu.memory_space<vmem>>, vector<1x1x8x128xbf16>
    %49 = vector.shape_cast %48 : vector<1x1x8x128xbf16> to vector<8x128xbf16>
    %50 = vector.shape_cast %46 : vector<8x128xbf16> to vector<1x1x8x128xbf16>
    tpu.vector_store %arg5[%c0_15, %47, %c0_16, %c0_17], %50 {strides = array<i32>} : memref<1x4x8x128xbf16, #tpu.memory_space<vmem>>, vector<1x1x8x128xbf16>,
    %c1_i32 = arith.constant 1 : i32
    %c2_i32_18 = arith.constant 2 : i32
    %51 = arith.muli %c2_i32_18, %c1_i32 : i32
    %c3_i32_19 = arith.constant 3 : i32
    %52 = arith.subi %c3_i32_19, %51 : i32
    %53 = arith.muli %arg0, %52 : i32
    %54 = arith.addi %c1_i32, %53 : i32
    %c0_20 = arith.constant 0 : index
    %55 = arith.index_cast %54 : i32 to index
    %c0_21 = arith.constant 0 : index
    %c0_22 = arith.constant 0 : index
    %56 = vector.load %arg2[%c0_20, %55, %c0_21, %c0_22] : memref<1x4x8x384xbf16, #tpu.memory_space<vmem>>, vector<1x1x8x384xbf16>
    %57 = vector.shape_cast %56 : vector<1x1x8x384xbf16> to vector<8x384xbf16>
    %58 = arith.extf %57 : vector<8x384xbf16> to vector<8x384xf32>
    %59 = arith.truncf %45 : vector<8x128xf32> to vector<8x128xbf16>
    %cst_23 = arith.constant dense<0.000000e+00> : vector<8x384xf32>
    %60 = tpu.matmul %59, %4, %cst_23 {dimension_numbers = #tpu.dot_dimension_numbers<[1], [0], [0], [1], [0, 0, 1, 1], [], []>} : vector<8x128xbf16>, vector<128x384xbf16>, vector<8x384xf32> -> vector<8x384xf32>
    %61 = vector.extract_strided_slice %58 {offsets = [0, 0], sizes = [8, 128], strides = [1, 1]} : vector<8x384xf32> to vector<8x128xf32>
    %62 = vector.extract_strided_slice %60 {offsets = [0, 0], sizes = [8, 128], strides = [1, 1]} : vector<8x384xf32> to vector<8x128xf32>
    %63 = arith.addf %61, %62 : vector<8x128xf32>
    %64 = arith.negf %63 : vector<8x128xf32>
    %65 = math.exp %64 : vector<8x128xf32>
    %cst_24 = arith.constant 1.000000e+00 : f32
    %66 = vector.broadcast %cst_24 : f32 to vector<8x128xf32>
    %67 = arith.addf %66, %65 : vector<8x128xf32>
    %68 = arith.divf %66, %67 : vector<8x128xf32>
    %69 = vector.extract_strided_slice %58 {offsets = [0, 128], sizes = [8, 128], strides = [1, 1]} : vector<8x384xf32> to vector<8x128xf32>
    %70 = vector.extract_strided_slice %60 {offsets = [0, 128], sizes = [8, 128], strides = [1, 1]} : vector<8x384xf32> to vector<8x128xf32>
    %71 = arith.addf %69, %70 : vector<8x128xf32>
    %72 = arith.negf %71 : vector<8x128xf32>
    %73 = math.exp %72 : vector<8x128xf32>
    %cst_25 = arith.constant 1.000000e+00 : f32
    %74 = vector.broadcast %cst_25 : f32 to vector<8x128xf32>
    %75 = arith.addf %74, %73 : vector<8x128xf32>
    %76 = arith.divf %74, %75 : vector<8x128xf32>
    %77 = vector.extract_strided_slice %58 {offsets = [0, 256], sizes = [8, 128], strides = [1, 1]} : vector<8x384xf32> to vector<8x128xf32>
    %78 = vector.extract_strided_slice %60 {offsets = [0, 256], sizes = [8, 128], strides = [1, 1]} : vector<8x384xf32> to vector<8x128xf32>
    %79 = vector.broadcast %6 : vector<1x128xf32> to vector<8x128xf32>
    %80 = arith.addf %78, %79 : vector<8x128xf32>
    %81 = arith.mulf %68, %80 : vector<8x128xf32>
    %82 = arith.addf %77, %81 : vector<8x128xf32>
    %83 = math.tanh %82 : vector<8x128xf32>
    %cst_26 = arith.constant 1.000000e+00 : f32
    %84 = vector.broadcast %cst_26 : f32 to vector<8x128xf32>
    %85 = arith.subf %84, %76 : vector<8x128xf32>
    %86 = arith.mulf %85, %83 : vector<8x128xf32>
    %87 = arith.mulf %76, %45 : vector<8x128xf32>
    %88 = arith.addf %86, %87 : vector<8x128xf32>
    %89 = arith.truncf %88 : vector<8x128xf32> to vector<8x128xbf16>
    %c0_27 = arith.constant 0 : index
    %90 = arith.index_cast %54 : i32 to index
    %c0_28 = arith.constant 0 : index
    %c0_29 = arith.constant 0 : index
    %91 = vector.load %arg5[%c0_27, %90, %c0_28, %c0_29] : memref<1x4x8x128xbf16, #tpu.memory_space<vmem>>, vector<1x1x8x128xbf16>
    %92 = vector.shape_cast %91 : vector<1x1x8x128xbf16> to vector<8x128xbf16>
    %93 = vector.shape_cast %89 : vector<8x128xbf16> to vector<1x1x8x128xbf16>
    tpu.vector_store %arg5[%c0_27, %90, %c0_28, %c0_29], %93 {strides = array<i32>} : memref<1x4x8x128xbf16, #tpu.memory_space<vmem>>, vector<1x1x8x128xbf16>,
    %c2_i32_30 = arith.constant 2 : i32
    %c2_i32_31 = arith.constant 2 : i32
    %94 = arith.muli %c2_i32_31, %c2_i32_30 : i32
    %c3_i32_32 = arith.constant 3 : i32
    %95 = arith.subi %c3_i32_32, %94 : i32
    %96 = arith.muli %arg0, %95 : i32
    %97 = arith.addi %c2_i32_30, %96 : i32
    %c0_33 = arith.constant 0 : index
    %98 = arith.index_cast %97 : i32 to index
    %c0_34 = arith.constant 0 : index
    %c0_35 = arith.constant 0 : index
    %99 = vector.load %arg2[%c0_33, %98, %c0_34, %c0_35] : memref<1x4x8x384xbf16, #tpu.memory_space<vmem>>, vector<1x1x8x384xbf16>
    %100 = vector.shape_cast %99 : vector<1x1x8x384xbf16> to vector<8x384xbf16>
    %101 = arith.extf %100 : vector<8x384xbf16> to vector<8x384xf32>
    %102 = arith.truncf %88 : vector<8x128xf32> to vector<8x128xbf16>
    %cst_36 = arith.constant dense<0.000000e+00> : vector<8x384xf32>
    %103 = tpu.matmul %102, %4, %cst_36 {dimension_numbers = #tpu.dot_dimension_numbers<[1], [0], [0], [1], [0, 0, 1, 1], [], []>} : vector<8x128xbf16>, vector<128x384xbf16>, vector<8x384xf32> -> vector<8x384xf32>
    %104 = vector.extract_strided_slice %101 {offsets = [0, 0], sizes = [8, 128], strides = [1, 1]} : vector<8x384xf32> to vector<8x128xf32>
    %105 = vector.extract_strided_slice %103 {offsets = [0, 0], sizes = [8, 128], strides = [1, 1]} : vector<8x384xf32> to vector<8x128xf32>
    %106 = arith.addf %104, %105 : vector<8x128xf32>
    %107 = arith.negf %106 : vector<8x128xf32>
    %108 = math.exp %107 : vector<8x128xf32>
    %cst_37 = arith.constant 1.000000e+00 : f32
    %109 = vector.broadcast %cst_37 : f32 to vector<8x128xf32>
    %110 = arith.addf %109, %108 : vector<8x128xf32>
    %111 = arith.divf %109, %110 : vector<8x128xf32>
    %112 = vector.extract_strided_slice %101 {offsets = [0, 128], sizes = [8, 128], strides = [1, 1]} : vector<8x384xf32> to vector<8x128xf32>
    %113 = vector.extract_strided_slice %103 {offsets = [0, 128], sizes = [8, 128], strides = [1, 1]} : vector<8x384xf32> to vector<8x128xf32>
    %114 = arith.addf %112, %113 : vector<8x128xf32>
    %115 = arith.negf %114 : vector<8x128xf32>
    %116 = math.exp %115 : vector<8x128xf32>
    %cst_38 = arith.constant 1.000000e+00 : f32
    %117 = vector.broadcast %cst_38 : f32 to vector<8x128xf32>
    %118 = arith.addf %117, %116 : vector<8x128xf32>
    %119 = arith.divf %117, %118 : vector<8x128xf32>
    %120 = vector.extract_strided_slice %101 {offsets = [0, 256], sizes = [8, 128], strides = [1, 1]} : vector<8x384xf32> to vector<8x128xf32>
    %121 = vector.extract_strided_slice %103 {offsets = [0, 256], sizes = [8, 128], strides = [1, 1]} : vector<8x384xf32> to vector<8x128xf32>
    %122 = vector.broadcast %6 : vector<1x128xf32> to vector<8x128xf32>
    %123 = arith.addf %121, %122 : vector<8x128xf32>
    %124 = arith.mulf %111, %123 : vector<8x128xf32>
    %125 = arith.addf %120, %124 : vector<8x128xf32>
    %126 = math.tanh %125 : vector<8x128xf32>
    %cst_39 = arith.constant 1.000000e+00 : f32
    %127 = vector.broadcast %cst_39 : f32 to vector<8x128xf32>
    %128 = arith.subf %127, %119 : vector<8x128xf32>
    %129 = arith.mulf %128, %126 : vector<8x128xf32>
    %130 = arith.mulf %119, %88 : vector<8x128xf32>
    %131 = arith.addf %129, %130 : vector<8x128xf32>
    %132 = arith.truncf %131 : vector<8x128xf32> to vector<8x128xbf16>
    %c0_40 = arith.constant 0 : index
    %133 = arith.index_cast %97 : i32 to index
    %c0_41 = arith.constant 0 : index
    %c0_42 = arith.constant 0 : index
    %134 = vector.load %arg5[%c0_40, %133, %c0_41, %c0_42] : memref<1x4x8x128xbf16, #tpu.memory_space<vmem>>, vector<1x1x8x128xbf16>
    %135 = vector.shape_cast %134 : vector<1x1x8x128xbf16> to vector<8x128xbf16>
    %136 = vector.shape_cast %132 : vector<8x128xbf16> to vector<1x1x8x128xbf16>
    tpu.vector_store %arg5[%c0_40, %133, %c0_41, %c0_42], %136 {strides = array<i32>} : memref<1x4x8x128xbf16, #tpu.memory_space<vmem>>, vector<1x1x8x128xbf16>,
    %c3_i32_43 = arith.constant 3 : i32
    %c2_i32_44 = arith.constant 2 : i32
    %137 = arith.muli %c2_i32_44, %c3_i32_43 : i32
    %c3_i32_45 = arith.constant 3 : i32
    %138 = arith.subi %c3_i32_45, %137 : i32
    %139 = arith.muli %arg0, %138 : i32
    %140 = arith.addi %c3_i32_43, %139 : i32
    %c0_46 = arith.constant 0 : index
    %141 = arith.index_cast %140 : i32 to index
    %c0_47 = arith.constant 0 : index
    %c0_48 = arith.constant 0 : index
    %142 = vector.load %arg2[%c0_46, %141, %c0_47, %c0_48] : memref<1x4x8x384xbf16, #tpu.memory_space<vmem>>, vector<1x1x8x384xbf16>
    %143 = vector.shape_cast %142 : vector<1x1x8x384xbf16> to vector<8x384xbf16>
    %144 = arith.extf %143 : vector<8x384xbf16> to vector<8x384xf32>
    %145 = arith.truncf %131 : vector<8x128xf32> to vector<8x128xbf16>
    %cst_49 = arith.constant dense<0.000000e+00> : vector<8x384xf32>
    %146 = tpu.matmul %145, %4, %cst_49 {dimension_numbers = #tpu.dot_dimension_numbers<[1], [0], [0], [1], [0, 0, 1, 1], [], []>} : vector<8x128xbf16>, vector<128x384xbf16>, vector<8x384xf32> -> vector<8x384xf32>
    %147 = vector.extract_strided_slice %144 {offsets = [0, 0], sizes = [8, 128], strides = [1, 1]} : vector<8x384xf32> to vector<8x128xf32>
    %148 = vector.extract_strided_slice %146 {offsets = [0, 0], sizes = [8, 128], strides = [1, 1]} : vector<8x384xf32> to vector<8x128xf32>
    %149 = arith.addf %147, %148 : vector<8x128xf32>
    %150 = arith.negf %149 : vector<8x128xf32>
    %151 = math.exp %150 : vector<8x128xf32>
    %cst_50 = arith.constant 1.000000e+00 : f32
    %152 = vector.broadcast %cst_50 : f32 to vector<8x128xf32>
    %153 = arith.addf %152, %151 : vector<8x128xf32>
    %154 = arith.divf %152, %153 : vector<8x128xf32>
    %155 = vector.extract_strided_slice %144 {offsets = [0, 128], sizes = [8, 128], strides = [1, 1]} : vector<8x384xf32> to vector<8x128xf32>
    %156 = vector.extract_strided_slice %146 {offsets = [0, 128], sizes = [8, 128], strides = [1, 1]} : vector<8x384xf32> to vector<8x128xf32>
    %157 = arith.addf %155, %156 : vector<8x128xf32>
    %158 = arith.negf %157 : vector<8x128xf32>
    %159 = math.exp %158 : vector<8x128xf32>
    %cst_51 = arith.constant 1.000000e+00 : f32
    %160 = vector.broadcast %cst_51 : f32 to vector<8x128xf32>
    %161 = arith.addf %160, %159 : vector<8x128xf32>
    %162 = arith.divf %160, %161 : vector<8x128xf32>
    %163 = vector.extract_strided_slice %144 {offsets = [0, 256], sizes = [8, 128], strides = [1, 1]} : vector<8x384xf32> to vector<8x128xf32>
    %164 = vector.extract_strided_slice %146 {offsets = [0, 256], sizes = [8, 128], strides = [1, 1]} : vector<8x384xf32> to vector<8x128xf32>
    %165 = vector.broadcast %6 : vector<1x128xf32> to vector<8x128xf32>
    %166 = arith.addf %164, %165 : vector<8x128xf32>
    %167 = arith.mulf %154, %166 : vector<8x128xf32>
    %168 = arith.addf %163, %167 : vector<8x128xf32>
    %169 = math.tanh %168 : vector<8x128xf32>
    %cst_52 = arith.constant 1.000000e+00 : f32
    %170 = vector.broadcast %cst_52 : f32 to vector<8x128xf32>
    %171 = arith.subf %170, %162 : vector<8x128xf32>
    %172 = arith.mulf %171, %169 : vector<8x128xf32>
    %173 = arith.mulf %162, %131 : vector<8x128xf32>
    %174 = arith.addf %172, %173 : vector<8x128xf32>
    %175 = arith.truncf %174 : vector<8x128xf32> to vector<8x128xbf16>
    %c0_53 = arith.constant 0 : index
    %176 = arith.index_cast %140 : i32 to index
    %c0_54 = arith.constant 0 : index
    %c0_55 = arith.constant 0 : index
    %177 = vector.load %arg5[%c0_53, %176, %c0_54, %c0_55] : memref<1x4x8x128xbf16, #tpu.memory_space<vmem>>, vector<1x1x8x128xbf16>
    %178 = vector.shape_cast %177 : vector<1x1x8x128xbf16> to vector<8x128xbf16>
    %179 = vector.shape_cast %175 : vector<8x128xbf16> to vector<1x1x8x128xbf16>
    tpu.vector_store %arg5[%c0_53, %176, %c0_54, %c0_55], %179 {strides = array<i32>} : memref<1x4x8x128xbf16, #tpu.memory_space<vmem>>, vector<1x1x8x128xbf16>,
    %c4_i32 = arith.constant 4 : i32
    %c0_56 = arith.constant 0 : index
    %c0_57 = arith.constant 0 : index
    %180 = vector.load %arg6[%c0_56, %c0_57] : memref<8x128xf32, #tpu.memory_space<vmem>>, vector<8x128xf32>
    tpu.vector_store %arg6[%c0_56, %c0_57], %174 {strides = array<i32>} : memref<8x128xf32, #tpu.memory_space<vmem>>, vector<8x128xf32>,
    return
  }
  func.func @transform_0(%arg0: i32, %arg1: i32) -> (i32, i32, i32, i32) {
    %c2_i32 = arith.constant 2 : i32
    %0 = arith.muli %c2_i32, %arg1 : i32
    %c1_i32 = arith.constant 1 : i32
    %1 = arith.subi %c1_i32, %0 : i32
    %2 = arith.muli %arg0, %1 : i32
    %3 = arith.addi %arg1, %2 : i32
    %c0_i32 = arith.constant 0 : i32
    %c0_i32_0 = arith.constant 0 : i32
    %c0_i32_1 = arith.constant 0 : i32
    return %arg0, %3, %c0_i32, %c0_i32_0 : i32, i32, i32, i32
  }
  func.func @transform_1(%arg0: i32, %arg1: i32) -> (i32, i32, i32) {
    %c0_i32 = arith.constant 0 : i32
    %c0_i32_0 = arith.constant 0 : i32
    %c0_i32_1 = arith.constant 0 : i32
    return %arg0, %c0_i32, %c0_i32_0 : i32, i32, i32
  }
  func.func @transform_2(%arg0: i32, %arg1: i32) -> (i32, i32, i32) {
    %c0_i32 = arith.constant 0 : i32
    %c0_i32_0 = arith.constant 0 : i32
    %c0_i32_1 = arith.constant 0 : i32
    return %arg0, %c0_i32, %c0_i32_0 : i32, i32, i32
  }
  func.func @transform_3(%arg0: i32, %arg1: i32) -> (i32, i32, i32, i32) {
    %c2_i32 = arith.constant 2 : i32
    %0 = arith.muli %c2_i32, %arg1 : i32
    %c1_i32 = arith.constant 1 : i32
    %1 = arith.subi %c1_i32, %0 : i32
    %2 = arith.muli %arg0, %1 : i32
    %3 = arith.addi %arg1, %2 : i32
    %c0_i32 = arith.constant 0 : i32
    %c0_i32_0 = arith.constant 0 : i32
    %c0_i32_1 = arith.constant 0 : i32
    return %arg0, %3, %c0_i32, %c0_i32_0 : i32, i32, i32, i32
  }
}

</mosaic_0001>

<bundles_post_ra>
// kernel: encoder_forward.2
= control target key start
LH: loop header
LB: loop body
LE: loop exit
PB: predicated region body
PF: predicated region fallthrough
CT: control target
= control target key end

     0   :  { %s1453_s12 = smov 0   ;;  %s1455_s13 = smov 0   ;;  %s1792_s0 = inlined_call_operand.vmem [shape: bf16[2,8,8,384], index: 0, kind: input, shape index: {}]   ;;  %s1793_s1 = inlined_call_operand.vmem [shape: bf16[2,128,384], index: 1, kind: input, shape index: {}]   ;;  %s1794_s2 = inlined_call_operand.vmem [shape: f32[2,1,128], index: 2, kind: input, shape index: {}]   ;;  %s1795_s3 = inlined_call_operand.vmem [shape: bf16[2,8,8,128], index: 3, kind: output, shape index: {}]  }
   0x1   :  { %s1457_s14 = smov 0   ;;  %s1459_s15 = smov 0  }
   0x2   :  { %s1461_s16 = smov 0  }
   0x3 LB: > { %s22_s17 = sadd.s32 1, %s1419_s14  ;;  %s25_s18 = sadd.s32 1, %s1423_s15  ;;  %s1427_s16 = sphi %s1461_s16, %s13_s16   ;;  %s1423_s15 = sphi %s1459_s15, %s1799_s15   ;;  %s1419_s14 = sphi %s1457_s14, %s1798_s14   ;;  %s1415_s13 = sphi %s1455_s13, %s1797_s13   ;;  %s1411_s12 = sphi %s1453_s12, %s1796_s12  }
   0x4   : > { %p23_p0 = scmp.ge.s32.totalorder %s22_s17, 2  ;;  %p1092_p1 = scmp.ge.s32.totalorder %s1427_s16, 1 }
   0x5   : > { %p201_p2 = scmp.lt.s32.totalorder %s1427_s16, 5 }
   0x6   : > { %s1801_s17 = smov (%p23_p0, %s22_s17), 0  ;;  %s1803_s18 = smov (!%p23_p0, %s25_s18), %s1423_s15 }
   0x7   : > { %p202_p3 = pnand %p1092_p1, %p201_p2  ;;  %p27_p4 = scmp.ge.s32.totalorder %s1803_s18, 2 }
   0x8   : > { %s1093_s19 = sshll.u32 (!%p202_p3), %s1411_s12, 1  ;;  %p255_p5 = scmp.lt.s32.totalorder (!%p202_p3), %s1415_s13, 1 }
   0x9   : > { %s1805_s18 = smov (%p27_p4, %s1803_s18), 0  ;;  %205 = sbr.rel (%p202_p3) target bundleno = 1109 (0x455), region = 32 }
   0xa   : > { %s251_s20 = ssub.s32 (!%p202_p3), 1, %s1093_s19  ;;  %p1101_p7 = scmp.ne.s32.totalorder (!%p202_p3), %s1411_s12, 0 }
   0xb   : > { %s252_s21 = smul.u32 (!%p202_p3), %s1415_s13, %s251_s20 }
   0xd   : > { %s253_s23 = sadd.s32 (!%p202_p3), %s1411_s12, %s252_s21 }
   0xe   : > { %s1094_s24 = sshll.u32 (!%p202_p3), %s253_s23, 2 }
   0xf   : > { %p257_p6 = scmp.lt.s32.totalorder (!%p202_p3), %s1094_s24, 7 }
  0x10   : > { %s1491_s22 = scalar_select %p255_p5, %s1415_s13, 1 }
  0x11   : > { %s1807_s24 = smov (!%p257_p6, %s1094_s24), 7  ;;  %v1429_v0 = vmov (!%p1101_p7), 0.0  }
  0x12   : > { %s1271_s25 = smul.u32 24, %s1491_s22  ;;  %s276_s29 = scalar_lea.vmem %s1794_s2, %s1491_s22  ;;  %300 = vst [vmem:[#allocation2] sm:$0xff] (!%p1101_p7), %v1429_v0 }
  0x13   : > { %s1272_s26 = smul.u32 192, %s1491_s22  ;;  %s1099_s30 = sshll.u32 %s1491_s22, 3 }
  0x14   : > { %s1270_s7 = smul.u32 3, %s1807_s24  ;;  %s287_s8 = sadd.s32 %s1099_s30, %s1807_s24 }
  0x15   : > { %s1504_s6 = scalar_lea.vmem %s1793_s1, %s1272_s26  ;;  %s1100_s9 = sshll.u32 %s287_s8, 2 }
  0x16   : > { %s261_s10 = sadd.s32 %s1271_s25, %s1270_s7  ;;  %s1509_s20 = scalar_lea.vmem %s1795_s3, %s1100_s9 }
  0x17   : > { %s1095_s21 = sshll.u32 %s261_s10, 2  ;;  %299 = sbr.rel (%p1101_p7) target bundleno = 30 (0x1e), region = 36 }
  0x18   : > { %s1514_s28 = scalar_lea.vmem %s1792_s0, %s1095_s21 }
  0x1e PF: > { %v1518_v1 = vld [vmem:[%s1504_s6 + $0x4] ss:$12 sps:$4 sm:$0xff]   ;;  %v1521_v2 = vld [vmem:[%s1504_s6] ss:$12 sps:$4 sm:$0xff]   ;;  %v1430_v3 = vmov 0.0   ;;  %v1431_v4 = vmov 0  }
  0x1f   : > { %1190 = vmatprep.subr.bf16.mxu1 %v1430_v3  ;;  %505 = vmatprep.mubr.bf16.mxu0 %v1431_v4  ;;  %v1527_v5 = vld [vmem:[%s1504_s6 + $0x1c] ss:$12 sps:$4 sm:$0xff]   ;;  %vm1432_vm0 = vmmov 0   ;;  %v1533_v6 = vld [vmem:[%s1504_s6 + $0x18] ss:$12 sps:$4 sm:$0xff]   ;;  %s1151_s12 = smul.u32 36, %s1415_s13 }
  0x20   : > { %473 = vmatprep.subr.bf16.mxu0 %v1518_v1  ;;  %1206 = vmatprep.mubr.msk.bf16.mxu1 %vm1432_vm0, %v1430_v3  ;;  %v1537_v7 = vld [vmem:[%s1504_s6 + $0x34] ss:$12 sps:$4 sm:$0xff]   ;;  %v1541_v8 = vld [vmem:[%s1504_s6 + $0x30] ss:$12 sps:$4 sm:$0xff]   ;;  %v1545_v9 = vld [vmem:[%s1504_s6 + $0x4c] ss:$12 sps:$4 sm:$0xff]  }
  0x21   : > { %474 = vmatpush1.bf16.msra.mxu0 %v1521_v2  ;;  %v1548_v10 = vld [vmem:[%s1504_s6 + $0x8] ss:$12 sps:$4 sm:$0xff]   ;;  %v1557_v12 = vld [vmem:[%s1504_s6 + $0x64] ss:$12 sps:$4 sm:$0xff]   ;;  %v1561_v13 = vld [vmem:[%s1504_s6 + $0x20] ss:$12 sps:$4 sm:$0xff]   ;;  %s338_s24 = scalar_lea.vmem %s1514_s28, %s1151_s12 }
  0x22   : > { %475 = vmatprep.subr.bf16.mxu0 %v1527_v5  ;;  %v1552_v11 = vld [vmem:[%s1504_s6 + $0x48] ss:$12 sps:$4 sm:$0xff]   ;;  %1191 = vmatpush3.bf16.msra.mxu1 %v1548_v10  ;;  %v1564_v14 = vld [vmem:[%s1504_s6 + $0x60] ss:$12 sps:$4 sm:$0xff]   ;;  %v1569_v15 = vld [vmem:[%s1504_s6 + $0x38] ss:$12 sps:$4 sm:$0xff]  }
  0x23   : > { %1192 = vmatprep.subr.bf16.mxu1 %v1430_v3  ;;  %v1573_v16 = vld [vmem:[%s1504_s6 + $0x7c] ss:$12 sps:$4 sm:$0xff]   ;;  %v1578_v17 = vld [vmem:[%s1504_s6 + $0x78] ss:$12 sps:$4 sm:$0xff]   ;;  %v1586_v19 = vld [vmem:[%s1504_s6 + $0x94] ss:$12 sps:$4 sm:$0xff]  }
  0x24   : > { %v1582_v18 = vld [vmem:[%s1504_s6 + $0x50] ss:$12 sps:$4 sm:$0xff]   ;;  %v1595_v21 = vld [vmem:[%s1504_s6 + $0x68] ss:$12 sps:$4 sm:$0xff]   ;;  %v1599_v22 = vld [vmem:[%s1504_s6 + $0xac] ss:$12 sps:$4 sm:$0xff]  }
  0x25   : > { %476 = vmatpush1.bf16.msra.mxu0 %v1533_v6  ;;  %v1591_v20 = vld [vmem:[%s1504_s6 + $0x90] ss:$12 sps:$4 sm:$0xff]   ;;  %v1604_v23 = vld [vmem:[%s1504_s6 + $0xa8] ss:$12 sps:$4 sm:$0xff]   ;;  %v1606_v24 = vld [vmem:[#allocation2] sm:$0xff]  ;;  %s1152_s30 = smul.u32 12, %s1415_s13 }
  0x26   : > { %477 = vmatprep.subr.bf16.mxu0 %v1537_v7  ;;  %1193 = vmatpush3.bf16.msra.mxu1 %v1561_v13  ;;  %v1610_v25 = vld [vmem:[%s1504_s6 + $0x80] ss:$12 sps:$4 sm:$0xff]   ;;  %v344_v26 = vpack.c.bf16 %v1606_v24, %v1606_v24  ;;  %v1619_v27 = vld [vmem:[%s1504_s6 + $0x98] ss:$12 sps:$4 sm:$0xff]   ;;  %v1625_v28 = vld [vmem:[%s1504_s6 + $0xb0] ss:$12 sps:$4 sm:$0xff]  }
  0x27   : > { %1194 = vmatprep.subr.bf16.mxu1 %v1430_v3  ;;  %v339_v29 = vld [vmem:[%s338_s24] sm:$0xff]  ;;  %v340_v48 = vld [vmem:[%s338_s24 + $0x8] sm:$0xf]  ;;  %s584_s22 = scalar_lea.vmem %s1509_s20, %s1152_s30  ;;  %s1136_s4 = sshll.u32 %s1415_s13, 2 }
  0x28   : > { %v341_v30 = vunpack.c.l.bf16 %v339_v29  ;;  %v342_v32 = vunpack.c.h.bf16 %v339_v29  ;;  %v1672_v47 = vld [vmem:[%s276_s29] ss:$0 sm:$0xff]  ;;  %v343_v51 = vunpack.c.l.bf16 %v340_v48  ;;  %s1015_s29 = scalar_lea.vmem %s1514_s28, %s1152_s30  ;;  %s1018_s5 = scalar_lea.vmem %s1509_s20, %s1136_s4 }
  0x29   : > { %478 = vmatpush1.bf16.msra.mxu0 %v1541_v8  ;;  %v1132_v62 = vld [vmem:[%s1015_s29 + $0xc] sm:$0xff]  ;;  %s702_s6 = ssub.s32 2, %s1415_s13  ;;  %s1142_s11 = smul.u32 4294967260, %s1415_s13 }
  0x2a   : > { %479 = vmatprep.subr.bf16.mxu0 %v1545_v9  ;;  %1195 = vmatpush3.bf16.msra.mxu1 %v1569_v15  ;;  %v592_v63 = vunpack.c.l.bf16 %v1132_v62  ;;  %v593_v0 = vunpack.c.h.bf16 %v1132_v62  ;;  %s1153_s7 = smul.u32 12, %s702_s6  ;;  %s1141_s9 = sshll.u32 %s702_s6, 2 }
  0x2b   : > { %1196 = vmatprep.subr.bf16.mxu1 %v1430_v3  ;;  %s816_s10 = scalar_lea.vmem %s1509_s20, %s1141_s9  ;;  %s1026_s19 = scalar_lea.vmem %s1514_s28, %s1142_s11 }
  0x2c   : > { %s705_s8 = scalar_lea.vmem %s1514_s28, %s1153_s7  ;;  %s1147_s21 = smul.u32 4294967284, %s1415_s13 }
  0x2d   : > { %480 = vmatpush1.bf16.msra.mxu0 %v1552_v11 }
  0x2e   : > { %481 = vmatprep.subr.bf16.mxu0 %v1557_v12  ;;  %1197 = vmatpush3.bf16.msra.mxu1 %v1582_v18  ;;  %s1030_s23 = scalar_lea.vmem %s1509_s20, %s1147_s21 }
  0x2f   : > { %1198 = vmatprep.subr.bf16.mxu1 %v1430_v3 }
  0x31   : > { %482 = vmatpush1.bf16.msra.mxu0 %v1564_v14 }
  0x32   : > { %483 = vmatprep.subr.bf16.mxu0 %v1573_v16  ;;  %1199 = vmatpush3.bf16.msra.mxu1 %v1595_v21 }
  0x33   : > { %1200 = vmatprep.subr.bf16.mxu1 %v1430_v3 }
  0x35   : > { %484 = vmatpush1.bf16.msra.mxu0 %v1578_v17 }
  0x36   : > { %485 = vmatprep.subr.bf16.mxu0 %v1586_v19  ;;  %1201 = vmatpush3.bf16.msra.mxu1 %v1610_v25 }
  0x37   : > { %1202 = vmatprep.subr.bf16.mxu1 %v1430_v3 }
  0x39   : > { %486 = vmatpush1.bf16.msra.mxu0 %v1591_v20 }
  0x3a   : > { %487 = vmatprep.subr.bf16.mxu0 %v1599_v22  ;;  %1203 = vmatpush3.bf16.msra.mxu1 %v1619_v27 }
  0x3b   : > { %1204 = vmatprep.subr.bf16.mxu1 %v1430_v3 }
  0x3d   : > { %488 = vmatpush1.bf16.msra.mxu0 %v1604_v23 }
  0x3e   : > { %595 = vmatprep.subr.bf16.mxu0 %v1518_v1  ;;  %1205 = vmatpush3.bf16.msra.mxu1 %v1625_v28 }
  0x3f   : > { %1210 = vmatprep.subr.bf16.mxu1 %v1430_v3 }
  0x40   : > { %506 = vmatmul.mubr.bf16.vlgmr.msra.gmra.mrb[0].mxu0 %v344_v26 }
  0x41   : > { %596 = vmatpush1.bf16.msra.mxu0 %v1521_v2  ;;  %627 = vmatprep.mubr.bf16.mxu0 %v1431_v4 }
  0x42   : > { %597 = vmatprep.subr.bf16.mxu0 %v1527_v5  ;;  %1207 = vmatmul.mubr.bf16.vlgmr.msra.gmra.mrb[0].mxu1 %v344_v26 }
  0x43   : > { %1211 = vmatpush3.bf16.msra.mxu1 %v1548_v10  ;;  %1226 = vmatprep.mubr.msk.bf16.mxu1 %vm1432_vm0, %v1430_v3 }
  0x44   : > { %1212 = vmatprep.subr.bf16.mxu1 %v1430_v3 }
  0x45   : > { %598 = vmatpush1.bf16.msra.mxu0 %v1533_v6 }
  0x46   : > { %599 = vmatprep.subr.bf16.mxu0 %v1537_v7 }
  0x47   : > { %1213 = vmatpush3.bf16.msra.mxu1 %v1561_v13 }
  0x48   : > { %1214 = vmatprep.subr.bf16.mxu1 %v1430_v3 }
  0x49   : > { %600 = vmatpush1.bf16.msra.mxu0 %v1541_v8 }
  0x4a   : > { %601 = vmatprep.subr.bf16.mxu0 %v1545_v9 }
  0x4b   : > { %1215 = vmatpush3.bf16.msra.mxu1 %v1569_v15 }
  0x4c   : > { %1216 = vmatprep.subr.bf16.mxu1 %v1430_v3 }
  0x4d   : > { %602 = vmatpush1.bf16.msra.mxu0 %v1552_v11 }
  0x4e   : > { %603 = vmatprep.subr.bf16.mxu0 %v1557_v12 }
  0x4f   : > { %1217 = vmatpush3.bf16.msra.mxu1 %v1582_v18 }
  0x50   : > { %1218 = vmatprep.subr.bf16.mxu1 %v1430_v3 }
  0x51   : > { %604 = vmatpush1.bf16.msra.mxu0 %v1564_v14 }
  0x52   : > { %605 = vmatprep.subr.bf16.mxu0 %v1573_v16 }
  0x53   : > { %1219 = vmatpush3.bf16.msra.mxu1 %v1595_v21 }
  0x54   : > { %1220 = vmatprep.subr.bf16.mxu1 %v1430_v3 }
  0x55   : > { %606 = vmatpush1.bf16.msra.mxu0 %v1578_v17 }
  0x56   : > { %607 = vmatprep.subr.bf16.mxu0 %v1586_v19 }
  0x57   : > { %1221 = vmatpush3.bf16.msra.mxu1 %v1610_v25 }
  0x58   : > { %1222 = vmatprep.subr.bf16.mxu1 %v1430_v3 }
  0x59   : > { %608 = vmatpush1.bf16.msra.mxu0 %v1591_v20 }
  0x5a   : > { %609 = vmatprep.subr.bf16.mxu0 %v1599_v22 }
  0x5b   : > { %1223 = vmatpush3.bf16.msra.mxu1 %v1619_v27 }
  0x5c   : > { %1224 = vmatprep.subr.bf16.mxu1 %v1430_v3 }
  0x5d   : > { %610 = vmatpush1.bf16.msra.mxu0 %v1604_v23 }
  0x5e   : > { %711 = vmatprep.subr.bf16.mxu0 %v1518_v1 }
  0x5f   : > { %1225 = vmatpush3.bf16.msra.mxu1 %v1625_v28 }
  0x60   : > { %1230 = vmatprep.subr.bf16.mxu1 %v1430_v3 }
 0x113   : > { %v507_v31 = vpop.f32.mrb[0].mxu0 }
 0x114   : > { %v554_v33 = vadd.f32 %v507_v31, %v341_v30  ;;  %v509_v34 = vpop.f32.mrb[1].mxu0 }
 0x115   : > { %v511_v35 = vpop.f32.mrb[2].mxu0  ;;  %v561_v38 = vadd.f32 %v509_v34, %v342_v32  ;;  %v548_v40 = vpop.f32.mrb[0].mxu1 }
 0x116   : > { %v1128_v36 = vmul.f32 -1.442695, %v554_v33  ;;  %v512_v37 = vpop.f32.mrb[3].mxu0  ;;  %v1208_v41 = vpop.f32.mrb[1].mxu1  ;;  %v574_v50 = vadd.f32 %v1672_v47, %v548_v40 }
 0x117   : > { %v1129_v39 = vmul.f32 -1.442695, %v561_v38  ;;  %v551_v42 = vpop.f32.mrb[2].mxu1  ;;  %v1133_v41 = vld [vmem:[%s1015_s29 + $0x14] sm:$0xf] }
 0x118   : > { %1349 = vpow2.f32 %v1128_v36  ;;  %v1209_v43 = vpop.f32.mrb[3].mxu1 }
 0x119   : > { %1351 = vpow2.f32 %v1129_v39  ;;  %v594_v43 = vunpack.c.l.bf16 %v1133_v41 }
 0x122   : > { %v1350_v44 = vpop.eup %1349 }
 0x123   : > { %v558_v45 = vadd.f32 1.0, %v1350_v44  ;;  %v1352_v46 = vpop.eup %1351 }
 0x124   : > { %v565_v49 = vadd.f32 1.0, %v1352_v46 }
 0x125   : > { %1353 = vrcp.f32 %v558_v45 }
 0x126   : > { %1355 = vrcp.f32 %v565_v49 }
 0x12f   : > { %v1354_v52 = vpop.eup %1353 }
 0x130   : > { %v575_v53 = vmul.f32 %v1354_v52, %v574_v50  ;;  %v1356_v55 = vpop.eup %1355 }
 0x131   : > { %v578_v56 = vsub.f32 1.0, %v1356_v55  ;;  %v580_v59 = vmul.f32 %v1356_v55, %v1606_v24 }
 0x132   : > { %v576_v54 = vadd.f32 %v575_v53, %v343_v51 }
 0x134   : > { %1357 = vtanh.f32 %v576_v54 }
 0x13e   : > { %v1358_v57 = vpop.eup %1357 }
 0x13f   : > { %v579_v58 = vmul.f32 %v1358_v57, %v578_v56 }
 0x141   : > { %v1677_v60 = vadd.f32 %v580_v59, %v579_v58 }
 0x143   : > { %v582_v61 = vpack.c.bf16 %v1677_v60, %v1677_v60 }
 0x145   : > { %628 = vmatmul.mubr.bf16.vlgmr.msra.gmra.mrb[4].mxu0 %v582_v61  ;;  %1227 = vmatmul.mubr.bf16.vlgmr.msra.gmra.mrb[4].mxu1 %v582_v61  ;;  %585 = vst [vmem:[%s584_s22] sm:$0xf] %v582_v61 }
 0x146   : > { %712 = vmatpush1.bf16.msra.mxu0 %v1521_v2  ;;  %1231 = vmatpush3.bf16.msra.mxu1 %v1548_v10 }
 0x147   : > { %713 = vmatprep.subr.bf16.mxu0 %v1527_v5  ;;  %1232 = vmatprep.subr.bf16.mxu1 %v1430_v3 }
 0x148   : > { %743 = vmatprep.mubr.bf16.mxu0 %v1431_v4  ;;  %1246 = vmatprep.mubr.msk.bf16.mxu1 %vm1432_vm0, %v1430_v3 }
 0x14a   : > { %714 = vmatpush1.bf16.msra.mxu0 %v1533_v6  ;;  %1233 = vmatpush3.bf16.msra.mxu1 %v1561_v13 }
 0x14b   : > { %715 = vmatprep.subr.bf16.mxu0 %v1537_v7  ;;  %1234 = vmatprep.subr.bf16.mxu1 %v1430_v3 }
 0x14e   : > { %716 = vmatpush1.bf16.msra.mxu0 %v1541_v8  ;;  %1235 = vmatpush3.bf16.msra.mxu1 %v1569_v15 }
 0x14f   : > { %717 = vmatprep.subr.bf16.mxu0 %v1545_v9  ;;  %1236 = vmatprep.subr.bf16.mxu1 %v1430_v3 }
 0x152   : > { %718 = vmatpush1.bf16.msra.mxu0 %v1552_v11  ;;  %1237 = vmatpush3.bf16.msra.mxu1 %v1582_v18 }
 0x153   : > { %719 = vmatprep.subr.bf16.mxu0 %v1557_v12  ;;  %1238 = vmatprep.subr.bf16.mxu1 %v1430_v3 }
 0x156   : > { %720 = vmatpush1.bf16.msra.mxu0 %v1564_v14  ;;  %1239 = vmatpush3.bf16.msra.mxu1 %v1595_v21 }
 0x157   : > { %721 = vmatprep.subr.bf16.mxu0 %v1573_v16  ;;  %1240 = vmatprep.subr.bf16.mxu1 %v1430_v3 }
 0x15a   : > { %722 = vmatpush1.bf16.msra.mxu0 %v1578_v17  ;;  %1241 = vmatpush3.bf16.msra.mxu1 %v1610_v25 }
 0x15b   : > { %723 = vmatprep.subr.bf16.mxu0 %v1586_v19  ;;  %1242 = vmatprep.subr.bf16.mxu1 %v1430_v3 }
 0x15e   : > { %724 = vmatpush1.bf16.msra.mxu0 %v1591_v20  ;;  %1243 = vmatpush3.bf16.msra.mxu1 %v1619_v27 }
 0x15f   : > { %725 = vmatprep.subr.bf16.mxu0 %v1599_v22  ;;  %1244 = vmatprep.subr.bf16.mxu1 %v1430_v3 }
 0x162   : > { %726 = vmatpush1.bf16.msra.mxu0 %v1604_v23  ;;  %1245 = vmatpush3.bf16.msra.mxu1 %v1625_v28 }
 0x163   : > { %828 = vmatprep.subr.bf16.mxu0 %v1518_v1  ;;  %1250 = vmatprep.subr.bf16.mxu1 %v1430_v3 }
 0x218   : > { %v629_v24 = vpop.f32.mrb[4].mxu0  ;;  %v670_v26 = vpop.f32.mrb[4].mxu1 }
 0x219   : > { %v676_v29 = vadd.f32 %v629_v24, %v592_v63  ;;  %v631_v30 = vpop.f32.mrb[5].mxu0  ;;  %v1228_v31 = vpop.f32.mrb[5].mxu1  ;;  %v690_v44 = vadd.f32 %v1672_v47, %v670_v26  ;;  %v1143_v63 = vld [vmem:[%s1026_s19 + $0x24] sm:$0xff] }
 0x21a   : > { %v683_v32 = vadd.f32 %v631_v30, %v593_v0  ;;  %v633_v33 = vpop.f32.mrb[6].mxu0  ;;  %v673_v34 = vpop.f32.mrb[6].mxu1  ;;  %v825_v0 = vunpack.c.l.bf16 %v1143_v63 }
 0x21b   : > { %v1134_v35 = vmul.f32 -1.442695, %v676_v29  ;;  %v634_v36 = vpop.f32.mrb[7].mxu0  ;;  %v1229_v37 = vpop.f32.mrb[7].mxu1  ;;  %v826_v29 = vunpack.c.h.bf16 %v1143_v63 }
 0x21c   : > { %v1135_v1 = vmul.f32 -1.442695, %v683_v32 }
 0x21d   : > { %1359 = vpow2.f32 %v1134_v35 }
 0x21e   : > { %1361 = vpow2.f32 %v1135_v1 }
 0x227   : > { %v1360_v38 = vpop.eup %1359 }
 0x228   : > { %v680_v39 = vadd.f32 1.0, %v1360_v38  ;;  %v1362_v40 = vpop.eup %1361 }
 0x229   : > { %v687_v42 = vadd.f32 1.0, %v1362_v40 }
 0x22a   : > { %1363 = vrcp.f32 %v680_v39 }
 0x22b   : > { %1365 = vrcp.f32 %v687_v42  ;;  %v1144_v42 = vld [vmem:[%s1026_s19 + $0x2c] sm:$0xf] }
 0x234   : > { %v1364_v45 = vpop.eup %1363 }
 0x235   : > { %v691_v46 = vmul.f32 %v1364_v45, %v690_v44  ;;  %v1366_v49 = vpop.eup %1365  ;;  %v827_v44 = vunpack.c.l.bf16 %v1144_v42 }
 0x236   : > { %v694_v50 = vsub.f32 1.0, %v1366_v49  ;;  %v696_v53 = vmul.f32 %v1366_v49, %v1677_v60 }
 0x237   : > { %v692_v48 = vadd.f32 %v691_v46, %v594_v43 }
 0x239   : > { %1367 = vtanh.f32 %v692_v48 }
 0x243   : > { %v1368_v51 = vpop.eup %1367 }
 0x244   : > { %v695_v52 = vmul.f32 %v1368_v51, %v694_v50 }
 0x246   : > { %v1725_v54 = vadd.f32 %v696_v53, %v695_v52 }
 0x248   : > { %v698_v55 = vpack.c.bf16 %v1725_v54, %v1725_v54 }
 0x24a   : > { %1137 = vst [vmem:[%s1018_s5 + $0x4] sm:$0xf] %v698_v55  ;;  %744 = vmatmul.mubr.bf16.vlgmr.msra.gmra.mrb[8].mxu0 %v698_v55  ;;  %1247 = vmatmul.mubr.bf16.vlgmr.msra.gmra.mrb[8].mxu1 %v698_v55 }
 0x24b   : > { %829 = vmatpush1.bf16.msra.mxu0 %v1521_v2  ;;  %1251 = vmatpush3.bf16.msra.mxu1 %v1548_v10  ;;  %v706_v2 = vld [vmem:[%s705_s8] sm:$0xff] }
 0x24c   : > { %830 = vmatprep.subr.bf16.mxu0 %v1527_v5  ;;  %1252 = vmatprep.subr.bf16.mxu1 %v1430_v3 }
 0x24d   : > { %860 = vmatprep.mubr.bf16.mxu0 %v1431_v4  ;;  %1266 = vmatprep.mubr.msk.bf16.mxu1 %vm1432_vm0, %v1430_v3  ;;  %v708_v4 = vunpack.c.l.bf16 %v706_v2 }
 0x24f   : > { %831 = vmatpush1.bf16.msra.mxu0 %v1533_v6  ;;  %1253 = vmatpush3.bf16.msra.mxu1 %v1561_v13 }
 0x250   : > { %832 = vmatprep.subr.bf16.mxu0 %v1537_v7  ;;  %1254 = vmatprep.subr.bf16.mxu1 %v1430_v3  ;;  %v709_v7 = vunpack.c.h.bf16 %v706_v2 }
 0x253   : > { %833 = vmatpush1.bf16.msra.mxu0 %v1541_v8  ;;  %1255 = vmatpush3.bf16.msra.mxu1 %v1569_v15 }
 0x254   : > { %834 = vmatprep.subr.bf16.mxu0 %v1545_v9  ;;  %1256 = vmatprep.subr.bf16.mxu1 %v1430_v3 }
 0x257   : > { %835 = vmatpush1.bf16.msra.mxu0 %v1552_v11  ;;  %1257 = vmatpush3.bf16.msra.mxu1 %v1582_v18 }
 0x258   : > { %836 = vmatprep.subr.bf16.mxu0 %v1557_v12  ;;  %1258 = vmatprep.subr.bf16.mxu1 %v1430_v3 }
 0x25b   : > { %837 = vmatpush1.bf16.msra.mxu0 %v1564_v14  ;;  %1259 = vmatpush3.bf16.msra.mxu1 %v1595_v21 }
 0x25c   : > { %838 = vmatprep.subr.bf16.mxu0 %v1573_v16  ;;  %1260 = vmatprep.subr.bf16.mxu1 %v1430_v3 }
 0x25f   : > { %839 = vmatpush1.bf16.msra.mxu0 %v1578_v17  ;;  %1261 = vmatpush3.bf16.msra.mxu1 %v1610_v25 }
 0x260   : > { %840 = vmatprep.subr.bf16.mxu0 %v1586_v19  ;;  %1262 = vmatprep.subr.bf16.mxu1 %v1430_v3 }
 0x263   : > { %841 = vmatpush1.bf16.msra.mxu0 %v1591_v20  ;;  %1263 = vmatpush3.bf16.msra.mxu1 %v1619_v27  ;;  %v707_v20 = vld [vmem:[%s705_s8 + $0x8] sm:$0xf] }
 0x264   : > { %842 = vmatprep.subr.bf16.mxu0 %v1599_v22  ;;  %1264 = vmatprep.subr.bf16.mxu1 %v1430_v3  ;;  %v710_v22 = vunpack.c.l.bf16 %v707_v20 }
 0x267   : > { %843 = vmatpush1.bf16.msra.mxu0 %v1604_v23  ;;  %1265 = vmatpush3.bf16.msra.mxu1 %v1625_v28 }
 0x31d   : > { %v745_v5 = vpop.f32.mrb[8].mxu0  ;;  %v786_v6 = vpop.f32.mrb[8].mxu1 }
 0x31e   : > { %v792_v8 = vadd.f32 %v745_v5, %v708_v4  ;;  %v747_v9 = vpop.f32.mrb[9].mxu0  ;;  %v1248_v10 = vpop.f32.mrb[9].mxu1  ;;  %v806_v23 = vadd.f32 %v1672_v47, %v786_v6 }
 0x31f   : > { %v749_v11 = vpop.f32.mrb[10].mxu0  ;;  %v789_v12 = vpop.f32.mrb[10].mxu1  ;;  %v799_v15 = vadd.f32 %v747_v9, %v709_v7 }
 0x320   : > { %v1139_v13 = vmul.f32 -1.442695, %v792_v8  ;;  %v750_v3 = vpop.f32.mrb[11].mxu0  ;;  %v1249_v14 = vpop.f32.mrb[11].mxu1 }
 0x321   : > { %v1140_v16 = vmul.f32 -1.442695, %v799_v15 }
 0x322   : > { %1369 = vpow2.f32 %v1139_v13 }
 0x323   : > { %1371 = vpow2.f32 %v1140_v16 }
 0x32c   : > { %v1370_v17 = vpop.eup %1369 }
 0x32d   : > { %v796_v18 = vadd.f32 1.0, %v1370_v17  ;;  %v1372_v19 = vpop.eup %1371 }
 0x32e   : > { %v803_v21 = vadd.f32 1.0, %v1372_v19 }
 0x32f   : > { %1373 = vrcp.f32 %v796_v18 }
 0x330   : > { %1375 = vrcp.f32 %v803_v21 }
 0x339   : > { %v1374_v25 = vpop.eup %1373 }
 0x33a   : > { %v807_v27 = vmul.f32 %v1374_v25, %v806_v23  ;;  %v1376_v56 = vpop.eup %1375 }
 0x33b   : > { %v810_v57 = vsub.f32 1.0, %v1376_v56  ;;  %v812_v60 = vmul.f32 %v1376_v56, %v1725_v54 }
 0x33c   : > { %v808_v28 = vadd.f32 %v807_v27, %v710_v22 }
 0x33e   : > { %1377 = vtanh.f32 %v808_v28 }
 0x348   : > { %v1378_v58 = vpop.eup %1377 }
 0x349   : > { %v811_v59 = vmul.f32 %v1378_v58, %v810_v57 }
 0x34b   : > { %v813_v61 = vadd.f32 %v812_v60, %v811_v59 }
 0x34d   : > { %v814_v62 = vpack.c.bf16 %v813_v61, %v813_v61 }
 0x34f   : > { %817 = vst [vmem:[%s816_s10] sm:$0xf] %v814_v62  ;;  %861 = vmatmul.mubr.bf16.vlgmr.msra.gmra.mrb[12].mxu0 %v814_v62  ;;  %1267 = vmatmul.mubr.bf16.vlgmr.msra.gmra.mrb[12].mxu1 %v814_v62 }
 0x422   : > { %v862_v24 = vpop.f32.mrb[12].mxu0  ;;  %v903_v26 = vpop.f32.mrb[12].mxu1 }
 0x423   : > { %v909_v30 = vadd.f32 %v862_v24, %v825_v0  ;;  %v864_v31 = vpop.f32.mrb[13].mxu0  ;;  %v1268_v32 = vpop.f32.mrb[13].mxu1  ;;  %v923_v45 = vadd.f32 %v1672_v47, %v903_v26 }
 0x424   : > { %v866_v33 = vpop.f32.mrb[14].mxu0  ;;  %v906_v34 = vpop.f32.mrb[14].mxu1  ;;  %v916_v1 = vadd.f32 %v864_v31, %v826_v29 }
 0x425   : > { %v1145_v35 = vmul.f32 -1.442695, %v909_v30  ;;  %v867_v36 = vpop.f32.mrb[15].mxu0  ;;  %v1269_v37 = vpop.f32.mrb[15].mxu1 }
 0x426   : > { %v1146_v38 = vmul.f32 -1.442695, %v916_v1 }
 0x427   : > { %1379 = vpow2.f32 %v1145_v35 }
 0x428   : > { %1381 = vpow2.f32 %v1146_v38 }
 0x431   : > { %v1380_v39 = vpop.eup %1379 }
 0x432   : > { %v913_v40 = vadd.f32 1.0, %v1380_v39  ;;  %v1382_v41 = vpop.eup %1381 }
 0x433   : > { %v920_v43 = vadd.f32 1.0, %v1382_v41 }
 0x434   : > { %1383 = vrcp.f32 %v913_v40 }
 0x435   : > { %1385 = vrcp.f32 %v920_v43 }
 0x43e   : > { %v1384_v46 = vpop.eup %1383 }
 0x43f   : > { %v924_v48 = vmul.f32 %v1384_v46, %v923_v45  ;;  %v1386_v50 = vpop.eup %1385 }
 0x440   : > { %v927_v51 = vsub.f32 1.0, %v1386_v50  ;;  %v929_v54 = vmul.f32 %v1386_v50, %v813_v61 }
 0x441   : > { %v925_v49 = vadd.f32 %v924_v48, %v827_v44 }
 0x443   : > { %1387 = vtanh.f32 %v925_v49 }
 0x44d   : > { %v1388_v52 = vpop.eup %1387 }
 0x44e   : > { %v928_v53 = vmul.f32 %v1388_v52, %v927_v51 }
 0x450   : > { %v930_v55 = vadd.f32 %v929_v54, %v928_v53 }
 0x452   : > { %v931_v2 = vpack.c.bf16 %v930_v55, %v930_v55  ;;  %935 = vst [vmem:[#allocation2] sm:$0xff] %v930_v55 }
 0x454   : > { %1148 = vst [vmem:[%s1030_s23 + $0xc] sm:$0xf] %v931_v2 }
 0x455 PF: > { %s13_s16 = sadd.s32 1, %s1427_s16   ;;  %s1796_s12 = smov %s1419_s14 }
 0x456   : > { %p10_p8 = scmp.ge.s32.totalorder %s13_s16, 6   ;;  %s1797_s13 = smov %s1423_s15 }
 0x457   : > { %s1798_s14 = smov %s1801_s17  ;;  %s1799_s15 = smov %s1805_s18 }
 0x458   :  { %12 = sbr.rel (!%p10_p8) target bundleno = 3 (0x3), region = 80 }

</bundles_post_ra>
